<compile_context>
chip_gen: v5e
topology: v5e:2x2
jax: 0.10.0
libtpu: 0.0.40
codegen_flags: <defaults>
</compile_context>

<pallas_src>
import functools
import math

import jax
import jax.numpy as jnp
from jax.experimental import pallas as pl
from jax.experimental.pallas import tpu as pltpu

# ----------------------------- configuration --------------------------------
B = 2            # batch
T = 8            # sequence length == maxlen
D = 32           # d_model
V = 16           # vocab size
DP = 128         # lane-padded feature width (TPU lane count)
BT = B * T       # total rows
EPS = 1e-5       # nn.LayerNorm default eps


# ----------------------------- Pallas kernel --------------------------------
def _embed_body(idx_ref, tok_ref, pe_ref, g_ref, b_ref, o_ref, x_scr):
    # idx_ref: (BT,) int32 in SMEM        tok_ref: (V, DP) f32 in VMEM
    # pe_ref : (BT, DP) f32 in VMEM or None
    # g_ref/b_ref: (1, DP) f32 in VMEM    o_ref/x_scr: (BT, DP) f32 in VMEM

    # Scalar-driven embedding gather: SMEM index -> dynamic row slice of the
    # VMEM-resident table, one unmasked 128-lane row per step.
    for i in range(BT):
        x_scr[pl.ds(i, 1), :] = tok_ref[pl.ds(idx_ref[i], 1), :]

    x = x_scr[...]                                            # (BT, DP)
    if pe_ref is not None:                                    # rpe == False
        x = x + pe_ref[...]                                   # pre-tiled PE

    # LayerNorm over the first D lanes. Pad lanes of x are exactly zero, so
    # both sums are already correct with a 1/D scale (one-pass variance).
    inv_d = 1.0 / D
    mu = jnp.sum(x, axis=-1, keepdims=True) * inv_d
    var = jnp.sum(x * x, axis=-1, keepdims=True) * inv_d - mu * mu
    # Pad-lane outputs are zeroed by g_ref/b_ref pads (and sliced off anyway).
    o_ref[...] = (x - mu) * jax.lax.rsqrt(var + EPS) * g_ref[...] + b_ref[...]


def _kernel_with_pe(idx_ref, tok_ref, pe_ref, g_ref, b_ref, o_ref, x_scr):
    _embed_body(idx_ref, tok_ref, pe_ref, g_ref, b_ref, o_ref, x_scr)


def _kernel_no_pe(idx_ref, tok_ref, g_ref, b_ref, o_ref, x_scr):
    _embed_body(idx_ref, tok_ref, None, g_ref, b_ref, o_ref, x_scr)


# ----------------------------- wrapper ---------------------------------------
def _pad_lanes(a):
    return jnp.zeros(a.shape[:-1] + (DP,), a.dtype).at[..., : a.shape[-1]].set(a)


@functools.partial(jax.jit, static_argnames="rpe")
def pallas_embedding(idx, tok_pad, pe_tiled, g_pad, b_pad, *, rpe):
    ids = idx.reshape(BT).astype(jnp.int32)

    vmem = pl.BlockSpec(memory_space=pltpu.MemorySpace.VMEM)
    smem = pl.BlockSpec(memory_space=pltpu.MemorySpace.SMEM)

    if rpe:
        kernel = _kernel_no_pe
        operands = (ids, tok_pad, g_pad, b_pad)
        in_specs = [smem, vmem, vmem, vmem]
    else:
        kernel = _kernel_with_pe
        operands = (ids, tok_pad, pe_tiled, g_pad, b_pad)
        in_specs = [smem, vmem, vmem, vmem, vmem]

    out = pl.pallas_call(
        kernel,
        out_shape=jax.ShapeDtypeStruct((BT, DP), jnp.float32),
        in_specs=in_specs,
        out_specs=vmem,
        scratch_shapes=[pltpu.VMEM((BT, DP), jnp.float32)],
    )(*operands)
    # Lane slice + reshape fuse with the kernel under jit (no extra dispatch).
    return out[:, :D].reshape(B, T, D)


# ----------------------------- pure-JAX reference ----------------------------
def ref_embedding(idx, tok, pe, gamma, beta, *, rpe):
    emb = tok[idx]                                            # (B, T, D)
    if not rpe:
        emb = emb + pe[None]
    mu = jnp.mean(emb, axis=-1, keepdims=True)
    var = jnp.mean((emb - mu) ** 2, axis=-1, keepdims=True)
    return (emb - mu) * jax.lax.rsqrt(var + EPS) * gamma + beta


# ----------------------------- parameter init --------------------------------
def init_params(key):
    # nn.Embedding default init N(0,1), padding_idx=0 row zeroed.
    tok = jax.random.normal(key, (V, D), dtype=jnp.float32)
    tok = tok.at[0].set(0.0)

    # Sinusoidal positional-encoding buffer (registered buffer in the module).
    pos = jnp.arange(T, dtype=jnp.float32)[:, None]
    div = jnp.exp(jnp.arange(0, D, 2, dtype=jnp.float32) * (-math.log(10000.0) / D))
    pe = jnp.zeros((T, D), jnp.float32)
    pe = pe.at[:, 0::2].set(jnp.sin(pos * div))
    pe = pe.at[:, 1::2].set(jnp.cos(pos * div))

    gamma = jnp.ones((D,), jnp.float32)
    beta = jnp.zeros((D,), jnp.float32)
    return tok, pe, gamma, beta


# ----------------------------- main -------------------------------------------
if __name__ == "__main__":
    root = jax.random.PRNGKey(0)
    k_tok, k_idx = jax.random.split(root)

    tok, pe, gamma, beta = init_params(k_tok)
    # Lane-padded / pre-tiled constant buffers (built once, like register_buffer).
    tok_pad = _pad_lanes(tok)                       # (V, 128)
    pe_tiled = jnp.tile(_pad_lanes(pe), (B, 1))     # (B*T, 128), row b*T+t = pe[t]
    g_pad = _pad_lanes(gamma[None, :])              # (1, 128)
    b_pad = _pad_lanes(beta[None, :])               # (1, 128)

    idx = jax.random.randint(k_idx, (B, T), 0, V, dtype=jnp.int32)  # (2, 8)

    for rpe in (True, False):                       # exercise both module branches
        out = pallas_embedding(idx, tok_pad, pe_tiled, g_pad, b_pad, rpe=rpe)
        out = jax.block_until_ready(out)
        ref = jax.block_until_ready(ref_embedding(idx, tok, pe, gamma, beta, rpe=rpe))

        assert out.shape == (B, T, D), out.shape
        assert bool(jnp.all(jnp.isfinite(out)))
        err = float(jnp.max(jnp.abs(out - ref)))
        assert err < 1e-4, err

    print("KERNEL_OK")
</pallas_src>

<mosaic_0001>
module attributes {stable_mosaic.version = 11 : i64} {
  func.func @_kernel_no_pe(%arg0: memref<16xi32, #tpu.memory_space<smem>>, %arg1: memref<16x128xf32, #tpu.memory_space<vmem>>, %arg2: memref<1x128xf32, #tpu.memory_space<vmem>>, %arg3: memref<1x128xf32, #tpu.memory_space<vmem>>, %arg4: memref<16x128xf32, #tpu.memory_space<vmem>>, %arg5: memref<16x128xf32, #tpu.memory_space<vmem>>) attributes {dimension_semantics = [], scalar_prefetch = 0 : i64, scratch_operands = 1 : i64, tpu.core_type = #tpu.core_type<tc>} {
    %c0 = arith.constant 0 : index
    %0 = memref.load %arg0[%c0] : memref<16xi32, #tpu.memory_space<smem>>
    %1 = arith.index_cast %0 : i32 to index
    %c0_0 = arith.constant 0 : index
    %2 = vector.load %arg1[%1, %c0_0] : memref<16x128xf32, #tpu.memory_space<vmem>>, vector<1x128xf32>
    %c0_1 = arith.constant 0 : index
    %c0_2 = arith.constant 0 : index
    %3 = vector.load %arg5[%c0_1, %c0_2] : memref<16x128xf32, #tpu.memory_space<vmem>>, vector<1x128xf32>
    tpu.vector_store %arg5[%c0_1, %c0_2], %2 {strides = array<i32>} : memref<16x128xf32, #tpu.memory_space<vmem>>, vector<1x128xf32>,
    %c1 = arith.constant 1 : index
    %4 = memref.load %arg0[%c1] : memref<16xi32, #tpu.memory_space<smem>>
    %5 = arith.index_cast %4 : i32 to index
    %c0_3 = arith.constant 0 : index
    %6 = vector.load %arg1[%5, %c0_3] : memref<16x128xf32, #tpu.memory_space<vmem>>, vector<1x128xf32>
    %c1_4 = arith.constant 1 : index
    %c0_5 = arith.constant 0 : index
    %7 = vector.load %arg5[%c1_4, %c0_5] : memref<16x128xf32, #tpu.memory_space<vmem>>, vector<1x128xf32>
    tpu.vector_store %arg5[%c1_4, %c0_5], %6 {strides = array<i32>} : memref<16x128xf32, #tpu.memory_space<vmem>>, vector<1x128xf32>,
    %c2 = arith.constant 2 : index
    %8 = memref.load %arg0[%c2] : memref<16xi32, #tpu.memory_space<smem>>
    %9 = arith.index_cast %8 : i32 to index
    %c0_6 = arith.constant 0 : index
    %10 = vector.load %arg1[%9, %c0_6] : memref<16x128xf32, #tpu.memory_space<vmem>>, vector<1x128xf32>
    %c2_7 = arith.constant 2 : index
    %c0_8 = arith.constant 0 : index
    %11 = vector.load %arg5[%c2_7, %c0_8] : memref<16x128xf32, #tpu.memory_space<vmem>>, vector<1x128xf32>
    tpu.vector_store %arg5[%c2_7, %c0_8], %10 {strides = array<i32>} : memref<16x128xf32, #tpu.memory_space<vmem>>, vector<1x128xf32>,
    %c3 = arith.constant 3 : index
    %12 = memref.load %arg0[%c3] : memref<16xi32, #tpu.memory_space<smem>>
    %13 = arith.index_cast %12 : i32 to index
    %c0_9 = arith.constant 0 : index
    %14 = vector.load %arg1[%13, %c0_9] : memref<16x128xf32, #tpu.memory_space<vmem>>, vector<1x128xf32>
    %c3_10 = arith.constant 3 : index
    %c0_11 = arith.constant 0 : index
    %15 = vector.load %arg5[%c3_10, %c0_11] : memref<16x128xf32, #tpu.memory_space<vmem>>, vector<1x128xf32>
    tpu.vector_store %arg5[%c3_10, %c0_11], %14 {strides = array<i32>} : memref<16x128xf32, #tpu.memory_space<vmem>>, vector<1x128xf32>,
    %c4 = arith.constant 4 : index
    %16 = memref.load %arg0[%c4] : memref<16xi32, #tpu.memory_space<smem>>
    %17 = arith.index_cast %16 : i32 to index
    %c0_12 = arith.constant 0 : index
    %18 = vector.load %arg1[%17, %c0_12] : memref<16x128xf32, #tpu.memory_space<vmem>>, vector<1x128xf32>
    %c4_13 = arith.constant 4 : index
    %c0_14 = arith.constant 0 : index
    %19 = vector.load %arg5[%c4_13, %c0_14] : memref<16x128xf32, #tpu.memory_space<vmem>>, vector<1x128xf32>
    tpu.vector_store %arg5[%c4_13, %c0_14], %18 {strides = array<i32>} : memref<16x128xf32, #tpu.memory_space<vmem>>, vector<1x128xf32>,
    %c5 = arith.constant 5 : index
    %20 = memref.load %arg0[%c5] : memref<16xi32, #tpu.memory_space<smem>>
    %21 = arith.index_cast %20 : i32 to index
    %c0_15 = arith.constant 0 : index
    %22 = vector.load %arg1[%21, %c0_15] : memref<16x128xf32, #tpu.memory_space<vmem>>, vector<1x128xf32>
    %c5_16 = arith.constant 5 : index
    %c0_17 = arith.constant 0 : index
    %23 = vector.load %arg5[%c5_16, %c0_17] : memref<16x128xf32, #tpu.memory_space<vmem>>, vector<1x128xf32>
    tpu.vector_store %arg5[%c5_16, %c0_17], %22 {strides = array<i32>} : memref<16x128xf32, #tpu.memory_space<vmem>>, vector<1x128xf32>,
    %c6 = arith.constant 6 : index
    %24 = memref.load %arg0[%c6] : memref<16xi32, #tpu.memory_space<smem>>
    %25 = arith.index_cast %24 : i32 to index
    %c0_18 = arith.constant 0 : index
    %26 = vector.load %arg1[%25, %c0_18] : memref<16x128xf32, #tpu.memory_space<vmem>>, vector<1x128xf32>
    %c6_19 = arith.constant 6 : index
    %c0_20 = arith.constant 0 : index
    %27 = vector.load %arg5[%c6_19, %c0_20] : memref<16x128xf32, #tpu.memory_space<vmem>>, vector<1x128xf32>
    tpu.vector_store %arg5[%c6_19, %c0_20], %26 {strides = array<i32>} : memref<16x128xf32, #tpu.memory_space<vmem>>, vector<1x128xf32>,
    %c7 = arith.constant 7 : index
    %28 = memref.load %arg0[%c7] : memref<16xi32, #tpu.memory_space<smem>>
    %29 = arith.index_cast %28 : i32 to index
    %c0_21 = arith.constant 0 : index
    %30 = vector.load %arg1[%29, %c0_21] : memref<16x128xf32, #tpu.memory_space<vmem>>, vector<1x128xf32>
    %c7_22 = arith.constant 7 : index
    %c0_23 = arith.constant 0 : index
    %31 = vector.load %arg5[%c7_22, %c0_23] : memref<16x128xf32, #tpu.memory_space<vmem>>, vector<1x128xf32>
    tpu.vector_store %arg5[%c7_22, %c0_23], %30 {strides = array<i32>} : memref<16x128xf32, #tpu.memory_space<vmem>>, vector<1x128xf32>,
    %c8 = arith.constant 8 : index
    %32 = memref.load %arg0[%c8] : memref<16xi32, #tpu.memory_space<smem>>
    %33 = arith.index_cast %32 : i32 to index
    %c0_24 = arith.constant 0 : index
    %34 = vector.load %arg1[%33, %c0_24] : memref<16x128xf32, #tpu.memory_space<vmem>>, vector<1x128xf32>
    %c8_25 = arith.constant 8 : index
    %c0_26 = arith.constant 0 : index
    %35 = vector.load %arg5[%c8_25, %c0_26] : memref<16x128xf32, #tpu.memory_space<vmem>>, vector<1x128xf32>
    tpu.vector_store %arg5[%c8_25, %c0_26], %34 {strides = array<i32>} : memref<16x128xf32, #tpu.memory_space<vmem>>, vector<1x128xf32>,
    %c9 = arith.constant 9 : index
    %36 = memref.load %arg0[%c9] : memref<16xi32, #tpu.memory_space<smem>>
    %37 = arith.index_cast %36 : i32 to index
    %c0_27 = arith.constant 0 : index
    %38 = vector.load %arg1[%37, %c0_27] : memref<16x128xf32, #tpu.memory_space<vmem>>, vector<1x128xf32>
    %c9_28 = arith.constant 9 : index
    %c0_29 = arith.constant 0 : index
    %39 = vector.load %arg5[%c9_28, %c0_29] : memref<16x128xf32, #tpu.memory_space<vmem>>, vector<1x128xf32>
    tpu.vector_store %arg5[%c9_28, %c0_29], %38 {strides = array<i32>} : memref<16x128xf32, #tpu.memory_space<vmem>>, vector<1x128xf32>,
    %c10 = arith.constant 10 : index
    %40 = memref.load %arg0[%c10] : memref<16xi32, #tpu.memory_space<smem>>
    %41 = arith.index_cast %40 : i32 to index
    %c0_30 = arith.constant 0 : index
    %42 = vector.load %arg1[%41, %c0_30] : memref<16x128xf32, #tpu.memory_space<vmem>>, vector<1x128xf32>
    %c10_31 = arith.constant 10 : index
    %c0_32 = arith.constant 0 : index
    %43 = vector.load %arg5[%c10_31, %c0_32] : memref<16x128xf32, #tpu.memory_space<vmem>>, vector<1x128xf32>
    tpu.vector_store %arg5[%c10_31, %c0_32], %42 {strides = array<i32>} : memref<16x128xf32, #tpu.memory_space<vmem>>, vector<1x128xf32>,
    %c11 = arith.constant 11 : index
    %44 = memref.load %arg0[%c11] : memref<16xi32, #tpu.memory_space<smem>>
    %45 = arith.index_cast %44 : i32 to index
    %c0_33 = arith.constant 0 : index
    %46 = vector.load %arg1[%45, %c0_33] : memref<16x128xf32, #tpu.memory_space<vmem>>, vector<1x128xf32>
    %c11_34 = arith.constant 11 : index
    %c0_35 = arith.constant 0 : index
    %47 = vector.load %arg5[%c11_34, %c0_35] : memref<16x128xf32, #tpu.memory_space<vmem>>, vector<1x128xf32>
    tpu.vector_store %arg5[%c11_34, %c0_35], %46 {strides = array<i32>} : memref<16x128xf32, #tpu.memory_space<vmem>>, vector<1x128xf32>,
    %c12 = arith.constant 12 : index
    %48 = memref.load %arg0[%c12] : memref<16xi32, #tpu.memory_space<smem>>
    %49 = arith.index_cast %48 : i32 to index
    %c0_36 = arith.constant 0 : index
    %50 = vector.load %arg1[%49, %c0_36] : memref<16x128xf32, #tpu.memory_space<vmem>>, vector<1x128xf32>
    %c12_37 = arith.constant 12 : index
    %c0_38 = arith.constant 0 : index
    %51 = vector.load %arg5[%c12_37, %c0_38] : memref<16x128xf32, #tpu.memory_space<vmem>>, vector<1x128xf32>
    tpu.vector_store %arg5[%c12_37, %c0_38], %50 {strides = array<i32>} : memref<16x128xf32, #tpu.memory_space<vmem>>, vector<1x128xf32>,
    %c13 = arith.constant 13 : index
    %52 = memref.load %arg0[%c13] : memref<16xi32, #tpu.memory_space<smem>>
    %53 = arith.index_cast %52 : i32 to index
    %c0_39 = arith.constant 0 : index
    %54 = vector.load %arg1[%53, %c0_39] : memref<16x128xf32, #tpu.memory_space<vmem>>, vector<1x128xf32>
    %c13_40 = arith.constant 13 : index
    %c0_41 = arith.constant 0 : index
    %55 = vector.load %arg5[%c13_40, %c0_41] : memref<16x128xf32, #tpu.memory_space<vmem>>, vector<1x128xf32>
    tpu.vector_store %arg5[%c13_40, %c0_41], %54 {strides = array<i32>} : memref<16x128xf32, #tpu.memory_space<vmem>>, vector<1x128xf32>,
    %c14 = arith.constant 14 : index
    %56 = memref.load %arg0[%c14] : memref<16xi32, #tpu.memory_space<smem>>
    %57 = arith.index_cast %56 : i32 to index
    %c0_42 = arith.constant 0 : index
    %58 = vector.load %arg1[%57, %c0_42] : memref<16x128xf32, #tpu.memory_space<vmem>>, vector<1x128xf32>
    %c14_43 = arith.constant 14 : index
    %c0_44 = arith.constant 0 : index
    %59 = vector.load %arg5[%c14_43, %c0_44] : memref<16x128xf32, #tpu.memory_space<vmem>>, vector<1x128xf32>
    tpu.vector_store %arg5[%c14_43, %c0_44], %58 {strides = array<i32>} : memref<16x128xf32, #tpu.memory_space<vmem>>, vector<1x128xf32>,
    %c15 = arith.constant 15 : index
    %60 = memref.load %arg0[%c15] : memref<16xi32, #tpu.memory_space<smem>>
    %61 = arith.index_cast %60 : i32 to index
    %c0_45 = arith.constant 0 : index
    %62 = vector.load %arg1[%61, %c0_45] : memref<16x128xf32, #tpu.memory_space<vmem>>, vector<1x128xf32>
    %c15_46 = arith.constant 15 : index
    %c0_47 = arith.constant 0 : index
    %63 = vector.load %arg5[%c15_46, %c0_47] : memref<16x128xf32, #tpu.memory_space<vmem>>, vector<1x128xf32>
    tpu.vector_store %arg5[%c15_46, %c0_47], %62 {strides = array<i32>} : memref<16x128xf32, #tpu.memory_space<vmem>>, vector<1x128xf32>,
    %c0_48 = arith.constant 0 : index
    %c0_49 = arith.constant 0 : index
    %64 = vector.load %arg5[%c0_48, %c0_49] : memref<16x128xf32, #tpu.memory_space<vmem>>, vector<16x128xf32>
    %cst = arith.constant dense<0.000000e+00> : vector<16xf32>
    %65 = vector.multi_reduction <add>, %64, %cst [1] : vector<16x128xf32> to vector<16xf32>
    %66 = vector.shape_cast %65 : vector<16xf32> to vector<16x1xf32>
    %cst_50 = arith.constant 3.125000e-02 : f32
    %67 = vector.broadcast %cst_50 : f32 to vector<16x1xf32>
    %68 = arith.mulf %66, %67 : vector<16x1xf32>
    %69 = arith.mulf %64, %64 : vector<16x128xf32>
    %cst_51 = arith.constant dense<0.000000e+00> : vector<16xf32>
    %70 = vector.multi_reduction <add>, %69, %cst_51 [1] : vector<16x128xf32> to vector<16xf32>
    %71 = vector.shape_cast %70 : vector<16xf32> to vector<16x1xf32>
    %cst_52 = arith.constant 3.125000e-02 : f32
    %72 = vector.broadcast %cst_52 : f32 to vector<16x1xf32>
    %73 = arith.mulf %71, %72 : vector<16x1xf32>
    %74 = arith.mulf %68, %68 : vector<16x1xf32>
    %75 = arith.subf %73, %74 : vector<16x1xf32>
    %76 = vector.broadcast %68 : vector<16x1xf32> to vector<16x128xf32>
    %77 = arith.subf %64, %76 : vector<16x128xf32>
    %cst_53 = arith.constant 9.99999974E-6 : f32
    %78 = vector.broadcast %cst_53 : f32 to vector<16x1xf32>
    %79 = arith.addf %75, %78 : vector<16x1xf32>
    %80 = math.rsqrt %79 : vector<16x1xf32>
    %81 = vector.broadcast %80 : vector<16x1xf32> to vector<16x128xf32>
    %82 = arith.mulf %77, %81 : vector<16x128xf32>
    %c0_54 = arith.constant 0 : index
    %c0_55 = arith.constant 0 : index
    %83 = vector.load %arg2[%c0_54, %c0_55] : memref<1x128xf32, #tpu.memory_space<vmem>>, vector<1x128xf32>
    %84 = vector.broadcast %83 : vector<1x128xf32> to vector<16x128xf32>
    %85 = arith.mulf %82, %84 : vector<16x128xf32>
    %c0_56 = arith.constant 0 : index
    %c0_57 = arith.constant 0 : index
    %86 = vector.load %arg3[%c0_56, %c0_57] : memref<1x128xf32, #tpu.memory_space<vmem>>, vector<1x128xf32>
    %87 = vector.broadcast %86 : vector<1x128xf32> to vector<16x128xf32>
    %88 = arith.addf %85, %87 : vector<16x128xf32>
    %c0_58 = arith.constant 0 : index
    %c0_59 = arith.constant 0 : index
    %89 = vector.load %arg4[%c0_58, %c0_59] : memref<16x128xf32, #tpu.memory_space<vmem>>, vector<16x128xf32>
    tpu.vector_store %arg4[%c0_58, %c0_59], %88 {strides = array<i32>} : memref<16x128xf32, #tpu.memory_space<vmem>>, vector<16x128xf32>,
    return
  }
}

</mosaic_0001>

<bundles_post_ra>
// kernel: pallas_embedding.1
= control target key start
LH: loop header
LB: loop body
LE: loop exit
PB: predicated region body
PF: predicated region fallthrough
CT: control target
= control target key end

     0   :  { %9 = vsyncpa [#allocation5], 0  ;;  %s304_s0 = inlined_call_operand.vmem [shape: s32[16], index: 0, kind: input, shape index: {}]   ;;  %s305_s1 = inlined_call_operand.hbm [shape: f32[16,128], index: 1, kind: input, shape index: {}]   ;;  %s306_s2 = inlined_call_operand.vmem [shape: f32[1,128], index: 2, kind: input, shape index: {}]   ;;  %s307_s3 = inlined_call_operand.vmem [shape: f32[1,128], index: 3, kind: input, shape index: {}]   ;;  %s308_s4 = inlined_call_operand.vmem [shape: f32[16,128], index: 4, kind: output, shape index: {}]  }
   0x1   :  { %s16_s17 = sshll.u32 %s304_s0, 4  ;;  %s17_s17 = int_to_ptr.vmem [resolvable:$true] %s16_s17 }
   0x2   :  { %10 = vsyncpa [#allocation4], 0  ;;  %s24_s20 = sshll.u32 %s305_s1, 4  ;;  %s257_s21 = smov [#allocation3]   ;;  %s25_s20 = int_to_ptr.hbm [resolvable:$true] %s24_s20 }
   0x3   :  { %19 = dma.vmem_to_smem %s17_s17, 16, %s257_s21, [#allocation5]  }
   0x4   :  { %s258_s22 = smov [#allocation6]   ;;  %s259_s24 = smov 128  }
   0x5   :  { %s26_s23 = sshll.u32 %s258_s22, 4  ;;  %s260_s25 = smov 8   ;;  %s27_s23 = int_to_ptr.vmem [resolvable:$true] %s26_s23 }
   0x6   :  { %32 = dma.hbm_to_vmem [thread:$0]  %s25_s20, 256, %s27_s23, [#allocation4], %s259_s24, %s259_s24, %s260_s25  }
   0x7   :  { %253 = dma.done.wait [#allocation5], 16  }
   0x8   :  { %254 = vsyncadd [#allocation5], 4294967280 }
   0x9   :  { %255 = dma.done.wait [#allocation4], 256  }
   0xa   :  { %256 = vsyncadd [#allocation4], 4294967040 }
   0xb   :  { %45 = sfence }
   0xc   :  { %s46_s0 = sld [smem:[#allocation3]]  ;;  %v211_v41 = vld [vmem:[%s306_s2] ss:$0 sm:$0xff] }
   0xd   :  { %s192_s26 = sld [smem:[#allocation3 + $0x1]]  ;;  %v212_v43 = vld [vmem:[%s307_s3] ss:$0 sm:$0xff] }
   0xe   :  { %s193_s27 = sld [smem:[#allocation3 + $0x2]] }
   0xf   :  { %s194_s28 = sld [smem:[#allocation3 + $0x3]] }
  0x10   :  { %s195_s29 = sld [smem:[#allocation3 + $0x4]] }
  0x11   :  { %s196_s1 = sld [smem:[#allocation3 + $0x5]] }
  0x12   :  { %s197_s30 = sld [smem:[#allocation3 + $0x6]]  ;;  %s47_s5 = scalar_lea.vmem [#allocation6], %s46_s0 }
  0x13   :  { %v48_v0 = vld [vmem:[%s47_s5] sm:$0x1]  ;;  %s198_s6 = sld [smem:[#allocation3 + $0x7]]  ;;  %s51_s7 = scalar_lea.vmem [#allocation6], %s192_s26 }
  0x14   :  { %49 = vst [vmem:[#allocation2] sm:$0x1] %v48_v0  ;;  %v52_v1 = vld [vmem:[%s51_s7] sm:$0x1]  ;;  %s55_s8 = scalar_lea.vmem [#allocation6], %s193_s27  ;;  %s199_s14 = sld [smem:[#allocation3 + $0x8]] }
  0x15   :  { %53 = vst [vmem:[#allocation2 + $0x1] sm:$0x1] %v52_v1  ;;  %v56_v2 = vld [vmem:[%s55_s8] sm:$0x1]  ;;  %s59_s9 = scalar_lea.vmem [#allocation6], %s194_s28  ;;  %s200_s15 = sld [smem:[#allocation3 + $0x9]] }
  0x16   :  { %57 = vst [vmem:[#allocation2 + $0x2] sm:$0x1] %v56_v2  ;;  %v60_v3 = vld [vmem:[%s59_s9] sm:$0x1]  ;;  %s63_s10 = scalar_lea.vmem [#allocation6], %s195_s29  ;;  %s201_s16 = sld [smem:[#allocation3 + $0xa]] }
  0x17   :  { %61 = vst [vmem:[#allocation2 + $0x3] sm:$0x1] %v60_v3  ;;  %v64_v4 = vld [vmem:[%s63_s10] sm:$0x1]  ;;  %s67_s11 = scalar_lea.vmem [#allocation6], %s196_s1  ;;  %s202_s17 = sld [smem:[#allocation3 + $0xb]] }
  0x18   :  { %65 = vst [vmem:[#allocation2 + $0x4] sm:$0x1] %v64_v4  ;;  %v68_v5 = vld [vmem:[%s67_s11] sm:$0x1]  ;;  %s71_s12 = scalar_lea.vmem [#allocation6], %s197_s30  ;;  %s203_s18 = sld [smem:[#allocation3 + $0xc]] }
  0x19   :  { %69 = vst [vmem:[#allocation2 + $0x5] sm:$0x1] %v68_v5  ;;  %v72_v6 = vld [vmem:[%s71_s12] sm:$0x1]  ;;  %s75_s13 = scalar_lea.vmem [#allocation6], %s198_s6  ;;  %s204_s19 = sld [smem:[#allocation3 + $0xd]] }
  0x1a   :  { %73 = vst [vmem:[#allocation2 + $0x6] sm:$0x1] %v72_v6  ;;  %v76_v7 = vld [vmem:[%s75_s13] sm:$0x1]  ;;  %s205_s20 = sld [smem:[#allocation3 + $0xe]]  ;;  %s79_s21 = scalar_lea.vmem [#allocation6], %s199_s14 }
  0x1b   :  { %77 = vst [vmem:[#allocation2 + $0x7] sm:$0x1] %v76_v7  ;;  %v80_v8 = vld [vmem:[%s79_s21] sm:$0x1]  ;;  %s206_s22 = sld [smem:[#allocation3 + $0xf]]  ;;  %s83_s23 = scalar_lea.vmem [#allocation6], %s200_s15 }
  0x1c   :  { %81 = vst [vmem:[#allocation2 + $0x8] sm:$0x1] %v80_v8  ;;  %v84_v10 = vld [vmem:[%s83_s23] sm:$0x1]  ;;  %s87_s24 = scalar_lea.vmem [#allocation6], %s201_s16 }
  0x1d   :  { %85 = vst [vmem:[#allocation2 + $0x9] sm:$0x1] %v84_v10  ;;  %v88_v12 = vld [vmem:[%s87_s24] sm:$0x1]  ;;  %s91_s25 = scalar_lea.vmem [#allocation6], %s202_s17 }
  0x1e   :  { %89 = vst [vmem:[#allocation2 + $0xa] sm:$0x1] %v88_v12  ;;  %v92_v13 = vld [vmem:[%s91_s25] sm:$0x1]  ;;  %s95_s0 = scalar_lea.vmem [#allocation6], %s203_s18 }
  0x1f   :  { %93 = vst [vmem:[#allocation2 + $0xb] sm:$0x1] %v92_v13  ;;  %v96_v14 = vld [vmem:[%s95_s0] sm:$0x1]  ;;  %s99_s26 = scalar_lea.vmem [#allocation6], %s204_s19 }
  0x20   :  { %97 = vst [vmem:[#allocation2 + $0xc] sm:$0x1] %v96_v14  ;;  %v100_v15 = vld [vmem:[%s99_s26] sm:$0x1]  ;;  %s103_s27 = scalar_lea.vmem [#allocation6], %s205_s20 }
  0x21   :  { %101 = vst [vmem:[#allocation2 + $0xd] sm:$0x1] %v100_v15  ;;  %v104_v16 = vld [vmem:[%s103_s27] sm:$0x1]  ;;  %s107_s28 = scalar_lea.vmem [#allocation6], %s206_s22 }
  0x22   :  { %v110_v9 = vld [vmem:[#allocation2] sm:$0xff]  ;;  %105 = vst [vmem:[#allocation2 + $0xe] sm:$0x1] %v104_v16 }
  0x23   :  { %112 = vadd.xlane.f32.xlu0 %v110_v9  ;;  %v118_v11 = vmul.f32 %v110_v9, %v110_v9  ;;  %v108_v17 = vld [vmem:[%s107_s28] sm:$0x1] }
  0x24   :  { %109 = vst [vmem:[#allocation2 + $0xf] sm:$0x1] %v108_v17 }
  0x25   :  { %120 = vadd.xlane.f32.xlu1 %v118_v11 }
  0x2b   :  { %v111_v18 = vld [vmem:[#allocation2 + $0x8] sm:$0xff] }
  0x2c   :  { %114 = vadd.xlane.f32.xlu0 %v111_v18  ;;  %v119_v19 = vmul.f32 %v111_v18, %v111_v18 }
  0x2e   :  { %122 = vadd.xlane.f32.xlu1 %v119_v19 }
  0x96   :  { %v113_v20 = vpop.xlane.xlu0 %112 }
  0x97   :  { %v116_v21 = vmul.f32 0.03125, %v113_v20 }
  0x98   :  { %v121_v22 = vpop.xlane.xlu1 %120 }
  0x99   :  { %v126_v23 = vmul.f32 %v116_v21, %v116_v21  ;;  %v124_v24 = vmul.f32 0.03125, %v121_v22  ;;  %v130_v40 = vsub.f32 %v110_v9, %v116_v21 }
  0x9b   :  { %v128_v25 = vsub.f32 %v124_v24, %v126_v23 }
  0x9d   :  { %v132_v26 = vadd.f32 1e-05, %v128_v25 }
  0x9f   :  { %213 = vrsqrt.f32 %v132_v26  ;;  %v115_v27 = vpop.xlane.xlu0 %114  ;;  %vm140_vm1 = vweird.f32 %v132_v26 }
  0xa0   :  { %v117_v29 = vmul.f32 0.03125, %v115_v27 }
  0xa1   :  { %v123_v31 = vpop.xlane.xlu1 %122 }
  0xa2   :  { %v127_v32 = vmul.f32 %v117_v29, %v117_v29  ;;  %v125_v33 = vmul.f32 0.03125, %v123_v31  ;;  %v131_v53 = vsub.f32 %v111_v18, %v117_v29 }
  0xa4   :  { %v129_v35 = vsub.f32 %v125_v33, %v127_v32 }
  0xa5   :  { %v214_v28 = vpop.eup %213 }
  0xa6   :  { %v135_v30 = vmul.f32 %v214_v28, %v132_v26  ;;  %v133_v37 = vadd.f32 1e-05, %v129_v35  ;;  %vm141_vm0 = vweird.f32 %v214_v28 }
  0xa7   :  { %vm142_vm2 = vmor %vm140_vm1, %vm141_vm0 }
  0xa8   :  { %v136_v34 = vmul.f32 %v214_v28, %v135_v30  ;;  %215 = vrsqrt.f32 %v133_v37  ;;  %vm150_vm4 = vweird.f32 %v133_v37 }
  0xaa   :  { %v137_v36 = vmul.f32 0.5, %v136_v34 }
  0xac   :  { %v138_v38 = vsub.f32 1.5, %v137_v36 }
  0xae   :  { %v139_v39 = vmul.f32 %v214_v28, %v138_v38  ;;  %v216_v45 = vpop.eup %215 }
  0xaf   :  { %v145_v47 = vmul.f32 %v216_v45, %v133_v37  ;;  %vm151_vm3 = vweird.f32 %v216_v45 }
  0xb0   :  { %v143_v42 = vsel %vm142_vm2, %v214_v28, %v139_v39  ;;  %vm152_vm5 = vmor %vm150_vm4, %vm151_vm3 }
  0xb1   :  { %v154_v44 = vmul.f32 %v143_v42, %v130_v40  ;;  %v146_v49 = vmul.f32 %v216_v45, %v145_v47 }
  0xb3   :  { %v160_v46 = vmul.f32 %v211_v41, %v154_v44  ;;  %v147_v50 = vmul.f32 0.5, %v146_v49 }
  0xb5   :  { %v166_v48 = vadd.f32 %v212_v43, %v160_v46  ;;  %v148_v51 = vsub.f32 1.5, %v147_v50 }
  0xb7   :  { %168 = vst [vmem:[%s308_s4] sm:$0xff] %v166_v48  ;;  %v149_v52 = vmul.f32 %v216_v45, %v148_v51 }
  0xb9   :  { %v153_v54 = vsel %vm152_vm5, %v216_v45, %v149_v52 }
  0xba   :  { %v155_v55 = vmul.f32 %v153_v54, %v131_v53 }
  0xbc   :  { %v161_v56 = vmul.f32 %v211_v41, %v155_v55 }
  0xbe   :  { %v167_v57 = vadd.f32 %v212_v43, %v161_v56 }
  0xc0   :  { %169 = vst [vmem:[%s308_s4 + $0x8] sm:$0xff] %v167_v57 }
  0xc1   :  { %174 = vsyncpa [#allocation4], 1 }
  0xc2   :  { %175 = vsyncpa [#allocation5], 1 }

</bundles_post_ra>
